<compile_context>
chip_gen: v5e
topology: v5e:2x2
jax: 0.10.0
libtpu: 0.0.40
codegen_flags: <defaults>
</compile_context>

<pallas_src>
import jax
import jax.numpy as jnp
import numpy as np
from jax import lax
from jax.experimental import pallas as pl
from jax.experimental.pallas import tpu as pltpu


INPUT_SIZE = 26
HIDDEN_SIZE = 64
OUTPUT_SIZE = 1      # lane-reduction fc below assumes output_size == 1
HIDDEN_PAD = 128     # lane-dense hidden width


def _fused_rnn_fc_kernel(x_ref, wih_ref, bias_ref, whh_ref, wfc_ref, bfc_ref,
                         out_ref):
    """Single-invocation fused RNN + fc.

    x_ref   : (T, B, D)   VMEM  time-major input
    wih_ref : (D, Hp)     VMEM  W_ih^T zero-padded to Hp lanes
    bias_ref: (1, Hp)     VMEM  b_ih + b_hh, zero-padded
    whh_ref : (Hp, Hp)    VMEM  W_hh^T zero-padded
    wfc_ref : (1, Hp)     VMEM  fc weight row, zero-padded
    bfc_ref : (1, 1)      VMEM  fc bias
    out_ref : (B, 1)      VMEM  prediction
    """
    T, B, D = x_ref.shape
    Hp = whh_ref.shape[0]

    # --- Input projection for ALL timesteps as one MXU matmul (off the serial
    # recurrence path), bias folded in. proj[t] is a contiguous (B, Hp) slab.
    wih = wih_ref[...]
    bias = bias_ref[...]
    proj = jnp.dot(x_ref[...].reshape(T * B, D), wih,
                   preferred_element_type=jnp.float32) + bias
    proj = proj.reshape(T, B, Hp)

    # --- Serial recurrence. whh is read once; every unrolled step reuses the
    # same value so the MXU RHS push can be hoisted out of the chain.
    whh = whh_ref[...]
    h = jnp.zeros((B, Hp), jnp.float32)
    for t in range(T):  # T is small and static: full unroll with static slices
        h = jnp.tanh(proj[t]
                     + jnp.dot(h, whh, preferred_element_type=jnp.float32))

    # --- Final fc (Hp -> 1) as a lane reduction (XLU) + scalar bias.
    out_ref[...] = jnp.sum(h * wfc_ref[...], axis=-1, keepdims=True) + bfc_ref[...]


def prepare_params(params, hidden_pad=HIDDEN_PAD):
    """One-time weight prep: transpose, fuse biases, zero-pad H -> hidden_pad."""
    H, D = params["w_ih"].shape
    Hp = hidden_pad
    wih_t = jnp.zeros((D, Hp), jnp.float32).at[:, :H].set(params["w_ih"].T)
    whh_t = jnp.zeros((Hp, Hp), jnp.float32).at[:H, :H].set(params["w_hh"].T)
    bias = jnp.zeros((1, Hp), jnp.float32).at[0, :H].set(
        params["b_ih"] + params["b_hh"])
    # TODO(synk): lane-reduction fc assumes output_size == 1; use an MXU matmul
    # path if the head ever grows.
    wfc = jnp.zeros((1, Hp), jnp.float32).at[0, :H].set(params["w_fc"][0])
    bfc = params["b_fc"].reshape(1, 1).astype(jnp.float32)
    return {"wih_t": wih_t, "whh_t": whh_t, "bias": bias, "wfc": wfc, "bfc": bfc}


def position_predictor_forward(x, prepped):
    """x: (B, T, input_size) float32 -> (B, 1) float32."""
    B, T, D = x.shape
    x_tm = jnp.transpose(x, (1, 0, 2))  # time-major (T, B, D) for the kernel

    vmem = pl.BlockSpec(memory_space=pltpu.MemorySpace.VMEM)
    out = pl.pallas_call(
        _fused_rnn_fc_kernel,
        out_shape=jax.ShapeDtypeStruct((B, 1), jnp.float32),
        in_specs=[vmem] * 6,
        out_specs=vmem,
    )(x_tm, prepped["wih_t"], prepped["bias"], prepped["whh_t"],
      prepped["wfc"], prepped["bfc"])
    return out


def init_params(key, input_size=INPUT_SIZE, hidden_size=HIDDEN_SIZE,
                output_size=OUTPUT_SIZE):
    """Deterministic PyTorch-style uniform(-1/sqrt(H), 1/sqrt(H)) init."""
    ks = jax.random.split(key, 6)
    s = 1.0 / np.sqrt(hidden_size)
    u = lambda k, shape: jax.random.uniform(k, shape, jnp.float32, -s, s)
    return {
        "w_ih": u(ks[0], (hidden_size, input_size)),
        "w_hh": u(ks[1], (hidden_size, hidden_size)),
        "b_ih": u(ks[2], (hidden_size,)),
        "b_hh": u(ks[3], (hidden_size,)),
        "w_fc": u(ks[4], (output_size, hidden_size)),
        "b_fc": u(ks[5], (output_size,)),
    }


def reference_forward(x, p):
    """Pure-JAX reference matching PyTorch nn.RNN(batch_first=True) + Linear."""
    def step(h, x_t):
        h_new = jnp.tanh(x_t @ p["w_ih"].T + p["b_ih"]
                         + h @ p["w_hh"].T + p["b_hh"])
        return h_new, None
    h0 = jnp.zeros((x.shape[0], p["w_hh"].shape[0]), jnp.float32)
    h_last, _ = lax.scan(step, h0, jnp.transpose(x, (1, 0, 2)))
    return h_last @ p["w_fc"].T + p["b_fc"]


if __name__ == "__main__":
    key = jax.random.PRNGKey(0)
    k_params, k_x = jax.random.split(key)

    B, T = 8, 8  # small synthetic shapes: batch=8, seq=8, input=26, hidden=64
    params = init_params(k_params)
    prepped = prepare_params(params)                    # hoisted, once per model
    x = jax.random.normal(k_x, (B, T, INPUT_SIZE), jnp.float32)

    out = position_predictor_forward(x, prepped)
    out = jax.block_until_ready(out)

    ref = jax.block_until_ready(reference_forward(x, params))
    assert out.shape == (B, OUTPUT_SIZE)
    np.testing.assert_allclose(np.asarray(out), np.asarray(ref),
                               rtol=1e-5, atol=1e-5)
    print("KERNEL_OK")
</pallas_src>

<mosaic_0001>
module attributes {stable_mosaic.version = 11 : i64} {
  func.func @_fused_rnn_fc_kernel(%arg0: memref<8x8x26xf32, #tpu.memory_space<vmem>>, %arg1: memref<26x128xf32, #tpu.memory_space<vmem>>, %arg2: memref<1x128xf32, #tpu.memory_space<vmem>>, %arg3: memref<128x128xf32, #tpu.memory_space<vmem>>, %arg4: memref<1x128xf32, #tpu.memory_space<vmem>>, %arg5: memref<1x1xf32, #tpu.memory_space<vmem>>, %arg6: memref<8x1xf32, #tpu.memory_space<vmem>>) attributes {dimension_semantics = [], scalar_prefetch = 0 : i64, scratch_operands = 0 : i64, tpu.core_type = #tpu.core_type<tc>} {
    %c0 = arith.constant 0 : index
    %c0_0 = arith.constant 0 : index
    %0 = vector.load %arg1[%c0, %c0_0] : memref<26x128xf32, #tpu.memory_space<vmem>>, vector<26x128xf32>
    %c0_1 = arith.constant 0 : index
    %c0_2 = arith.constant 0 : index
    %1 = vector.load %arg2[%c0_1, %c0_2] : memref<1x128xf32, #tpu.memory_space<vmem>>, vector<1x128xf32>
    %c0_3 = arith.constant 0 : index
    %c0_4 = arith.constant 0 : index
    %c0_5 = arith.constant 0 : index
    %2 = vector.load %arg0[%c0_3, %c0_4, %c0_5] : memref<8x8x26xf32, #tpu.memory_space<vmem>>, vector<8x8x26xf32>
    %3 = vector.shape_cast %2 : vector<8x8x26xf32> to vector<64x26xf32>
    %cst = arith.constant dense<0.000000e+00> : vector<64x128xf32>
    %4 = tpu.matmul %3, %0, %cst {dimension_numbers = #tpu.dot_dimension_numbers<[1], [0], [0], [1], [0, 0, 1, 1], [], []>} : vector<64x26xf32>, vector<26x128xf32>, vector<64x128xf32> -> vector<64x128xf32>
    %5 = vector.broadcast %1 : vector<1x128xf32> to vector<64x128xf32>
    %6 = arith.addf %4, %5 : vector<64x128xf32>
    %7 = vector.shape_cast %6 : vector<64x128xf32> to vector<8x8x128xf32>
    %c0_6 = arith.constant 0 : index
    %c0_7 = arith.constant 0 : index
    %8 = vector.load %arg3[%c0_6, %c0_7] : memref<128x128xf32, #tpu.memory_space<vmem>>, vector<128x128xf32>
    %cst_8 = arith.constant 0.000000e+00 : f32
    %9 = vector.broadcast %cst_8 : f32 to vector<8x128xf32>
    %10 = vector.extract_strided_slice %7 {offsets = [0, 0, 0], sizes = [1, 8, 128], strides = [1, 1, 1]} : vector<8x8x128xf32> to vector<1x8x128xf32>
    %11 = vector.shape_cast %10 : vector<1x8x128xf32> to vector<8x128xf32>
    %cst_9 = arith.constant dense<0.000000e+00> : vector<8x128xf32>
    %12 = tpu.matmul %9, %8, %cst_9 {dimension_numbers = #tpu.dot_dimension_numbers<[1], [0], [0], [1], [0, 0, 1, 1], [], []>} : vector<8x128xf32>, vector<128x128xf32>, vector<8x128xf32> -> vector<8x128xf32>
    %13 = arith.addf %11, %12 : vector<8x128xf32>
    %14 = math.tanh %13 : vector<8x128xf32>
    %15 = vector.extract_strided_slice %7 {offsets = [1, 0, 0], sizes = [1, 8, 128], strides = [1, 1, 1]} : vector<8x8x128xf32> to vector<1x8x128xf32>
    %16 = vector.shape_cast %15 : vector<1x8x128xf32> to vector<8x128xf32>
    %cst_10 = arith.constant dense<0.000000e+00> : vector<8x128xf32>
    %17 = tpu.matmul %14, %8, %cst_10 {dimension_numbers = #tpu.dot_dimension_numbers<[1], [0], [0], [1], [0, 0, 1, 1], [], []>} : vector<8x128xf32>, vector<128x128xf32>, vector<8x128xf32> -> vector<8x128xf32>
    %18 = arith.addf %16, %17 : vector<8x128xf32>
    %19 = math.tanh %18 : vector<8x128xf32>
    %20 = vector.extract_strided_slice %7 {offsets = [2, 0, 0], sizes = [1, 8, 128], strides = [1, 1, 1]} : vector<8x8x128xf32> to vector<1x8x128xf32>
    %21 = vector.shape_cast %20 : vector<1x8x128xf32> to vector<8x128xf32>
    %cst_11 = arith.constant dense<0.000000e+00> : vector<8x128xf32>
    %22 = tpu.matmul %19, %8, %cst_11 {dimension_numbers = #tpu.dot_dimension_numbers<[1], [0], [0], [1], [0, 0, 1, 1], [], []>} : vector<8x128xf32>, vector<128x128xf32>, vector<8x128xf32> -> vector<8x128xf32>
    %23 = arith.addf %21, %22 : vector<8x128xf32>
    %24 = math.tanh %23 : vector<8x128xf32>
    %25 = vector.extract_strided_slice %7 {offsets = [3, 0, 0], sizes = [1, 8, 128], strides = [1, 1, 1]} : vector<8x8x128xf32> to vector<1x8x128xf32>
    %26 = vector.shape_cast %25 : vector<1x8x128xf32> to vector<8x128xf32>
    %cst_12 = arith.constant dense<0.000000e+00> : vector<8x128xf32>
    %27 = tpu.matmul %24, %8, %cst_12 {dimension_numbers = #tpu.dot_dimension_numbers<[1], [0], [0], [1], [0, 0, 1, 1], [], []>} : vector<8x128xf32>, vector<128x128xf32>, vector<8x128xf32> -> vector<8x128xf32>
    %28 = arith.addf %26, %27 : vector<8x128xf32>
    %29 = math.tanh %28 : vector<8x128xf32>
    %30 = vector.extract_strided_slice %7 {offsets = [4, 0, 0], sizes = [1, 8, 128], strides = [1, 1, 1]} : vector<8x8x128xf32> to vector<1x8x128xf32>
    %31 = vector.shape_cast %30 : vector<1x8x128xf32> to vector<8x128xf32>
    %cst_13 = arith.constant dense<0.000000e+00> : vector<8x128xf32>
    %32 = tpu.matmul %29, %8, %cst_13 {dimension_numbers = #tpu.dot_dimension_numbers<[1], [0], [0], [1], [0, 0, 1, 1], [], []>} : vector<8x128xf32>, vector<128x128xf32>, vector<8x128xf32> -> vector<8x128xf32>
    %33 = arith.addf %31, %32 : vector<8x128xf32>
    %34 = math.tanh %33 : vector<8x128xf32>
    %35 = vector.extract_strided_slice %7 {offsets = [5, 0, 0], sizes = [1, 8, 128], strides = [1, 1, 1]} : vector<8x8x128xf32> to vector<1x8x128xf32>
    %36 = vector.shape_cast %35 : vector<1x8x128xf32> to vector<8x128xf32>
    %cst_14 = arith.constant dense<0.000000e+00> : vector<8x128xf32>
    %37 = tpu.matmul %34, %8, %cst_14 {dimension_numbers = #tpu.dot_dimension_numbers<[1], [0], [0], [1], [0, 0, 1, 1], [], []>} : vector<8x128xf32>, vector<128x128xf32>, vector<8x128xf32> -> vector<8x128xf32>
    %38 = arith.addf %36, %37 : vector<8x128xf32>
    %39 = math.tanh %38 : vector<8x128xf32>
    %40 = vector.extract_strided_slice %7 {offsets = [6, 0, 0], sizes = [1, 8, 128], strides = [1, 1, 1]} : vector<8x8x128xf32> to vector<1x8x128xf32>
    %41 = vector.shape_cast %40 : vector<1x8x128xf32> to vector<8x128xf32>
    %cst_15 = arith.constant dense<0.000000e+00> : vector<8x128xf32>
    %42 = tpu.matmul %39, %8, %cst_15 {dimension_numbers = #tpu.dot_dimension_numbers<[1], [0], [0], [1], [0, 0, 1, 1], [], []>} : vector<8x128xf32>, vector<128x128xf32>, vector<8x128xf32> -> vector<8x128xf32>
    %43 = arith.addf %41, %42 : vector<8x128xf32>
    %44 = math.tanh %43 : vector<8x128xf32>
    %45 = vector.extract_strided_slice %7 {offsets = [7, 0, 0], sizes = [1, 8, 128], strides = [1, 1, 1]} : vector<8x8x128xf32> to vector<1x8x128xf32>
    %46 = vector.shape_cast %45 : vector<1x8x128xf32> to vector<8x128xf32>
    %cst_16 = arith.constant dense<0.000000e+00> : vector<8x128xf32>
    %47 = tpu.matmul %44, %8, %cst_16 {dimension_numbers = #tpu.dot_dimension_numbers<[1], [0], [0], [1], [0, 0, 1, 1], [], []>} : vector<8x128xf32>, vector<128x128xf32>, vector<8x128xf32> -> vector<8x128xf32>
    %48 = arith.addf %46, %47 : vector<8x128xf32>
    %49 = math.tanh %48 : vector<8x128xf32>
    %c0_17 = arith.constant 0 : index
    %c0_18 = arith.constant 0 : index
    %50 = vector.load %arg4[%c0_17, %c0_18] : memref<1x128xf32, #tpu.memory_space<vmem>>, vector<1x128xf32>
    %51 = vector.broadcast %50 : vector<1x128xf32> to vector<8x128xf32>
    %52 = arith.mulf %49, %51 : vector<8x128xf32>
    %cst_19 = arith.constant dense<0.000000e+00> : vector<8xf32>
    %53 = vector.multi_reduction <add>, %52, %cst_19 [1] : vector<8x128xf32> to vector<8xf32>
    %54 = vector.shape_cast %53 : vector<8xf32> to vector<8x1xf32>
    %c0_20 = arith.constant 0 : index
    %c0_21 = arith.constant 0 : index
    %55 = vector.load %arg5[%c0_20, %c0_21] : memref<1x1xf32, #tpu.memory_space<vmem>>, vector<1x1xf32>
    %56 = vector.broadcast %55 : vector<1x1xf32> to vector<8x1xf32>
    %57 = arith.addf %54, %56 : vector<8x1xf32>
    %c0_22 = arith.constant 0 : index
    %c0_23 = arith.constant 0 : index
    %58 = vector.load %arg6[%c0_22, %c0_23] : memref<8x1xf32, #tpu.memory_space<vmem>>, vector<8x1xf32>
    tpu.vector_store %arg6[%c0_22, %c0_23], %57 {strides = array<i32>} : memref<8x1xf32, #tpu.memory_space<vmem>>, vector<8x1xf32>,
    return
  }
}

</mosaic_0001>

<bundles_post_ra>
// kernel: tpu_custom_call.1
= control target key start
LH: loop header
LB: loop body
LE: loop exit
PB: predicated region body
PF: predicated region fallthrough
CT: control target
= control target key end

     0   :  { %s720_s0 = inlined_call_operand.hbm [shape: f32[8,8,26], index: 0, kind: input, shape index: {}]   ;;  %s721_s1 = inlined_call_operand.hbm [shape: f32[26,128], index: 1, kind: input, shape index: {}]   ;;  %s722_s2 = inlined_call_operand.vmem [shape: f32[1,128], index: 2, kind: input, shape index: {}]   ;;  %s723_s3 = inlined_call_operand.hbm [shape: f32[128,128], index: 3, kind: input, shape index: {}]   ;;  %s724_s4 = inlined_call_operand.vmem [shape: f32[1,128], index: 4, kind: input, shape index: {}]   ;;  %s725_s5 = inlined_call_operand.<no memory space> [shape: f32[1,1], index: 5, kind: input, shape index: {}]   ;;  %s726_s6 = inlined_call_operand.vmem [shape: f32[8,1], index: 6, kind: output, shape index: {}]  }
   0x1   :  { %v11_v0 = vstv %s725_s5 }
   0x2   :  { %12 = vst [vmem:[#allocation2] sm:$0x1] %v11_v0 }
   0x3   :  { %13 = vsyncpa [#allocation4], 0 }
   0x4   :  { %14 = vsyncpa [#allocation6], 0  ;;  %s32_s25 = sshll.u32 %s721_s1, 4  ;;  %s480_s26 = smov [#allocation5]   ;;  %s33_s25 = int_to_ptr.hbm [resolvable:$true] %s32_s25 }
   0x5   :  { %s34_s27 = sshll.u32 %s480_s26, 4  ;;  %s19_s30 = sshll.u32 %s720_s0, 4  ;;  %s35_s27 = int_to_ptr.vmem [resolvable:$true] %s34_s27  ;;  %s20_s30 = int_to_ptr.hbm [resolvable:$true] %s19_s30 }
   0x6   :  { %s481_s7 = smov 128   ;;  %s482_s8 = smov 8  }
   0x7   :  { %40 = dma.hbm_to_vmem [thread:$0]  %s33_s25, 512, %s35_s27, [#allocation6], %s481_s7, %s481_s7, %s482_s8  }
   0x8   :  { %s483_s5 = smov [#allocation3]   ;;  %s47_s12 = sshll.u32 %s723_s3, 4  ;;  %s48_s12 = int_to_ptr.hbm [resolvable:$true] %s47_s12 }
   0x9   :  { %s21_s9 = sshll.u32 %s483_s5, 4  ;;  %s484_s1 = smov [#allocation7]   ;;  %s22_s9 = int_to_ptr.vmem [resolvable:$true] %s21_s9 }
   0xa   :  { %27 = dma.hbm_to_vmem [thread:$0]  %s20_s30, 1024, %s22_s9, [#allocation4], %s481_s7, %s481_s7, %s482_s8  }
   0xb   :  { %s49_s13 = sshll.u32 %s484_s1, 4  ;;  %s50_s13 = int_to_ptr.vmem [resolvable:$true] %s49_s13 }
   0xc   :  { %55 = dma.hbm_to_vmem [thread:$0]  %s48_s12, 2048, %s50_s13, [#allocation6], %s481_s7, %s481_s7, %s482_s8  }
   0xd   :  { %476 = dma.done.wait [#allocation4], 1024  }
   0xe   :  { %477 = vsyncadd [#allocation4], 4294966272 }
   0xf   :  { %478 = dma.done.wait [#allocation6], 2560  }
  0x10   :  { %479 = vsyncadd [#allocation6], 4294964736  ;;  %v533_v1 = vld [vmem:[#allocation7 + $0x78] sm:$0xff]  ;;  %v535_v2 = vld [vmem:[#allocation7 + $0x70] sm:$0xff]  ;;  %vm113_vm0 = vcmask 1041408   ;;  %vm88_vm1 = vcmask 211968  }
  0x11   :  { %174 = vmatpush.msra.mxu1 %v533_v1  ;;  %196 = vmatpush.msra.mxu2 %v533_v1  ;;  %v539_v3 = vld [vmem:[#allocation7 + $0x68] sm:$0xff]  ;;  %v75_v4 = vld [vmem:[#allocation5 + $0x18] sm:$0x3]  ;;  %v544_v5 = vld [vmem:[#allocation7 + $0x60] sm:$0xff]  ;;  %v485_v22 = vmov 0.0   ;;  %vm362_vm2 = vcmask 7168  }
  0x12   :  { %218 = vmatpush.msra.mxu3 %v533_v1  ;;  %370 = vmatpush.msk.msra.mxu0 %vm113_vm0, %v75_v4  ;;  %v74_v6 = vld [vmem:[#allocation5 + $0x10] sm:$0xff]  ;;  %v73_v7 = vld [vmem:[#allocation5 + $0x8] sm:$0xff]  ;;  %v549_v8 = vld [vmem:[#allocation7 + $0x58] sm:$0xff] }
  0x13   :  { %175 = vmatpush.msra.mxu1 %v535_v2  ;;  %197 = vmatpush.msra.mxu2 %v535_v2  ;;  %v72_v9 = vld [vmem:[#allocation5] sm:$0xff]  ;;  %v554_v10 = vld [vmem:[#allocation7 + $0x50] sm:$0xff]  ;;  %v559_v12 = vld [vmem:[#allocation7 + $0x48] sm:$0xff] }
  0x14   :  { %219 = vmatpush.msra.mxu3 %v535_v2  ;;  %130 = vmatpush.msra.mxu0 %v74_v6  ;;  %v77_v11 = vld [vmem:[#allocation3] sm:$0xff]  ;;  %v570_v14 = vld [vmem:[#allocation7 + $0x38] sm:$0xff]  ;;  %v576_v15 = vld [vmem:[#allocation7 + $0x30] sm:$0xff] }
  0x15   :  { %176 = vmatpush.msra.mxu1 %v539_v3  ;;  %198 = vmatpush.msra.mxu2 %v539_v3  ;;  %v564_v13 = vld [vmem:[#allocation7 + $0x40] sm:$0xff]  ;;  %v582_v16 = vld [vmem:[#allocation7 + $0x28] sm:$0xff]  ;;  %v594_v18 = vld [vmem:[#allocation7 + $0x18] sm:$0xff] }
  0x16   :  { %220 = vmatpush.msra.mxu3 %v539_v3  ;;  %131 = vmatpush.msra.mxu0 %v73_v7  ;;  %v588_v17 = vld [vmem:[#allocation7 + $0x20] sm:$0xff]  ;;  %v600_v19 = vld [vmem:[#allocation7 + $0x10] sm:$0xff]  ;;  %v606_v20 = vld [vmem:[#allocation7 + $0x8] sm:$0xff] }
  0x17   :  { %177 = vmatpush.msra.mxu1 %v544_v5  ;;  %199 = vmatpush.msra.mxu2 %v544_v5  ;;  %v612_v21 = vld [vmem:[#allocation7] sm:$0xff]  ;;  %v78_v23 = vld [vmem:[#allocation3 + $0x8] sm:$0xff]  ;;  %v698_v24 = vld [vmem:[%s722_s2] ss:$0 sm:$0xff] }
  0x18   :  { %221 = vmatpush.msra.mxu3 %v544_v5  ;;  %132 = vmatpush.msra.mxu0 %v72_v9  ;;  %v79_v30 = vld [vmem:[#allocation3 + $0x10] sm:$0xff]  ;;  %v80_v36 = vld [vmem:[#allocation3 + $0x18] sm:$0xff]  ;;  %v81_v42 = vld [vmem:[#allocation3 + $0x20] sm:$0xff] }
  0x19   :  { %178 = vmatpush.msra.mxu1 %v549_v8  ;;  %200 = vmatpush.msra.mxu2 %v549_v8  ;;  %v82_v48 = vld [vmem:[#allocation3 + $0x28] sm:$0xff]  ;;  %v83_v49 = vld [vmem:[#allocation3 + $0x30] sm:$0xff]  ;;  %v84_v55 = vld [vmem:[#allocation3 + $0x38] sm:$0xff] }
  0x1a   :  { %222 = vmatpush.msra.mxu3 %v549_v8  ;;  %371 = vmatmul.msk.f32.vlgmr.msra.gmra.mxu0 %vm88_vm1, %v77_v11  ;;  %v386_v6 = vld [vmem:[%s724_s4] ss:$0 sm:$0xff] }
  0x1b   :  { %179 = vmatpush.msra.mxu1 %v554_v10  ;;  %201 = vmatpush.msra.mxu2 %v554_v10  ;;  %v387_v9 = vld [vmem:[#allocation2] ss:$0 sm:$0xff] }
  0x1c   :  { %223 = vmatpush.msra.mxu3 %v554_v10  ;;  %306 = vmatpush.msrb.mxu0 %v533_v1 }
  0x1d   :  { %180 = vmatpush.msra.mxu1 %v559_v12  ;;  %202 = vmatpush.msra.mxu2 %v559_v12 }
  0x1e   :  { %224 = vmatpush.msra.mxu3 %v559_v12  ;;  %307 = vmatpush.msrb.mxu0 %v535_v2 }
  0x1f   :  { %181 = vmatpush.msra.mxu1 %v564_v13  ;;  %203 = vmatpush.msra.mxu2 %v564_v13 }
  0x20   :  { %225 = vmatpush.msra.mxu3 %v564_v13  ;;  %308 = vmatpush.msrb.mxu0 %v539_v3 }
  0x21   :  { %182 = vmatpush.msra.mxu1 %v570_v14  ;;  %204 = vmatpush.msra.mxu2 %v570_v14 }
  0x22   :  { %226 = vmatpush.msra.mxu3 %v570_v14  ;;  %309 = vmatpush.msrb.mxu0 %v544_v5 }
  0x23   :  { %183 = vmatpush.msra.mxu1 %v576_v15  ;;  %205 = vmatpush.msra.mxu2 %v576_v15 }
  0x24   :  { %227 = vmatpush.msra.mxu3 %v576_v15  ;;  %310 = vmatpush.msrb.mxu0 %v549_v8 }
  0x25   :  { %184 = vmatpush.msra.mxu1 %v582_v16  ;;  %206 = vmatpush.msra.mxu2 %v582_v16 }
  0x26   :  { %228 = vmatpush.msra.mxu3 %v582_v16  ;;  %311 = vmatpush.msrb.mxu0 %v554_v10 }
  0x27   :  { %185 = vmatpush.msra.mxu1 %v588_v17  ;;  %207 = vmatpush.msra.mxu2 %v588_v17 }
  0x28   :  { %229 = vmatpush.msra.mxu3 %v588_v17  ;;  %312 = vmatpush.msrb.mxu0 %v559_v12 }
  0x29   :  { %186 = vmatpush.msra.mxu1 %v594_v18  ;;  %208 = vmatpush.msra.mxu2 %v594_v18 }
  0x2a   :  { %230 = vmatpush.msra.mxu3 %v594_v18  ;;  %313 = vmatpush.msrb.mxu0 %v564_v13 }
  0x2b   :  { %187 = vmatpush.msra.mxu1 %v600_v19  ;;  %209 = vmatpush.msra.mxu2 %v600_v19 }
  0x2c   :  { %231 = vmatpush.msra.mxu3 %v600_v19  ;;  %314 = vmatpush.msrb.mxu0 %v570_v14 }
  0x2d   :  { %188 = vmatpush.msra.mxu1 %v606_v20  ;;  %210 = vmatpush.msra.mxu2 %v606_v20 }
  0x2e   :  { %232 = vmatpush.msra.mxu3 %v606_v20  ;;  %315 = vmatpush.msrb.mxu0 %v576_v15 }
  0x2f   :  { %189 = vmatpush.msra.mxu1 %v612_v21  ;;  %211 = vmatpush.msra.mxu2 %v612_v21 }
  0x30   :  { %190 = vmatmul.f32.vlgmr.msra.gmra.mxu1 %v485_v22  ;;  %233 = vmatpush.msra.mxu3 %v612_v21 }
  0x31   :  { %240 = vmatpush.msrb.mxu1 %v533_v1  ;;  %262 = vmatpush.msrb.mxu2 %v533_v1 }
  0x32   :  { %284 = vmatpush.msrb.mxu3 %v533_v1  ;;  %316 = vmatpush.msrb.mxu0 %v582_v16 }
  0x33   :  { %241 = vmatpush.msrb.mxu1 %v535_v2  ;;  %263 = vmatpush.msrb.mxu2 %v535_v2 }
  0x34   :  { %285 = vmatpush.msrb.mxu3 %v535_v2  ;;  %317 = vmatpush.msrb.mxu0 %v588_v17 }
  0x35   :  { %242 = vmatpush.msrb.mxu1 %v539_v3  ;;  %264 = vmatpush.msrb.mxu2 %v539_v3 }
  0x36   :  { %286 = vmatpush.msrb.mxu3 %v539_v3  ;;  %318 = vmatpush.msrb.mxu0 %v594_v18 }
  0x37   :  { %243 = vmatpush.msrb.mxu1 %v544_v5  ;;  %265 = vmatpush.msrb.mxu2 %v544_v5 }
  0x38   :  { %287 = vmatpush.msrb.mxu3 %v544_v5  ;;  %319 = vmatpush.msrb.mxu0 %v600_v19 }
  0x39   :  { %244 = vmatpush.msrb.mxu1 %v549_v8  ;;  %266 = vmatpush.msrb.mxu2 %v549_v8 }
  0x3a   :  { %288 = vmatpush.msrb.mxu3 %v549_v8  ;;  %320 = vmatpush.msrb.mxu0 %v606_v20 }
  0x3b   :  { %245 = vmatpush.msrb.mxu1 %v554_v10  ;;  %267 = vmatpush.msrb.mxu2 %v554_v10 }
  0x3c   :  { %289 = vmatpush.msrb.mxu3 %v554_v10  ;;  %321 = vmatpush.msrb.mxu0 %v612_v21 }
  0x3d   :  { %246 = vmatpush.msrb.mxu1 %v559_v12  ;;  %268 = vmatpush.msrb.mxu2 %v559_v12 }
  0x3e   :  { %290 = vmatpush.msrb.mxu3 %v559_v12  ;;  %372 = vmatmul.msk.f32.gmra.mxu0 %vm88_vm1, %v78_v23 }
  0x3f   :  { %247 = vmatpush.msrb.mxu1 %v564_v13  ;;  %269 = vmatpush.msrb.mxu2 %v564_v13 }
  0x40   :  { %291 = vmatpush.msrb.mxu3 %v564_v13 }
  0x41   :  { %248 = vmatpush.msrb.mxu1 %v570_v14  ;;  %270 = vmatpush.msrb.mxu2 %v570_v14 }
  0x42   :  { %292 = vmatpush.msrb.mxu3 %v570_v14 }
  0x43   :  { %249 = vmatpush.msrb.mxu1 %v576_v15  ;;  %271 = vmatpush.msrb.mxu2 %v576_v15 }
  0x44   :  { %293 = vmatpush.msrb.mxu3 %v576_v15 }
  0x45   :  { %250 = vmatpush.msrb.mxu1 %v582_v16  ;;  %272 = vmatpush.msrb.mxu2 %v582_v16 }
  0x46   :  { %294 = vmatpush.msrb.mxu3 %v582_v16  ;;  %373 = vmatmul.msk.f32.gmra.mxu0 %vm88_vm1, %v79_v30 }
  0x47   :  { %251 = vmatpush.msrb.mxu1 %v588_v17  ;;  %273 = vmatpush.msrb.mxu2 %v588_v17 }
  0x48   :  { %295 = vmatpush.msrb.mxu3 %v588_v17 }
  0x49   :  { %252 = vmatpush.msrb.mxu1 %v594_v18  ;;  %274 = vmatpush.msrb.mxu2 %v594_v18 }
  0x4a   :  { %296 = vmatpush.msrb.mxu3 %v594_v18 }
  0x4b   :  { %253 = vmatpush.msrb.mxu1 %v600_v19  ;;  %275 = vmatpush.msrb.mxu2 %v600_v19 }
  0x4c   :  { %297 = vmatpush.msrb.mxu3 %v600_v19 }
  0x4d   :  { %254 = vmatpush.msrb.mxu1 %v606_v20  ;;  %276 = vmatpush.msrb.mxu2 %v606_v20 }
  0x4e   :  { %298 = vmatpush.msrb.mxu3 %v606_v20  ;;  %374 = vmatmul.msk.f32.gmra.mxu0 %vm88_vm1, %v80_v36 }
  0x4f   :  { %255 = vmatpush.msrb.mxu1 %v612_v21  ;;  %277 = vmatpush.msrb.mxu2 %v612_v21 }
  0x50   :  { %299 = vmatpush.msrb.mxu3 %v612_v21 }
  0x51   :  { %328 = vmatpush.msra.mxu1 %v533_v1 }
  0x53   :  { %329 = vmatpush.msra.mxu1 %v535_v2 }
  0x55   :  { %330 = vmatpush.msra.mxu1 %v539_v3 }
  0x56   :  { %375 = vmatmul.msk.f32.gmra.mxu0 %vm88_vm1, %v81_v42 }
  0x57   :  { %331 = vmatpush.msra.mxu1 %v544_v5 }
  0x59   :  { %332 = vmatpush.msra.mxu1 %v549_v8 }
  0x5b   :  { %333 = vmatpush.msra.mxu1 %v554_v10 }
  0x5d   :  { %334 = vmatpush.msra.mxu1 %v559_v12 }
  0x5e   :  { %376 = vmatmul.msk.f32.gmra.mxu0 %vm88_vm1, %v82_v48 }
  0x5f   :  { %335 = vmatpush.msra.mxu1 %v564_v13 }
  0x61   :  { %336 = vmatpush.msra.mxu1 %v570_v14 }
  0x63   :  { %337 = vmatpush.msra.mxu1 %v576_v15 }
  0x65   :  { %338 = vmatpush.msra.mxu1 %v582_v16 }
  0x66   :  { %377 = vmatmul.msk.f32.gmra.mxu0 %vm88_vm1, %v83_v49 }
  0x67   :  { %339 = vmatpush.msra.mxu1 %v588_v17 }
  0x69   :  { %340 = vmatpush.msra.mxu1 %v594_v18 }
  0x6b   :  { %341 = vmatpush.msra.mxu1 %v600_v19 }
  0x6d   :  { %342 = vmatpush.msra.mxu1 %v606_v20 }
  0x6e   :  { %378 = vmatmul.msk.f32.gmra.mxu0 %vm88_vm1, %v84_v55 }
  0x6f   :  { %343 = vmatpush.msra.mxu1 %v612_v21 }
  0x97   :  { %v134_v25 = vpop.f32.mrf.mxu0 }
  0x98   :  { %v135_v26 = vadd.f32 %v698_v24, %v134_v25 }
  0xad   :  { %v191_v27 = vpop.f32.mrf.mxu1 }
  0xae   :  { %v194_v28 = vadd.f32 %v191_v27, %v135_v26 }
  0xb0   :  { %388 = vtanh.f32 %v194_v28 }
  0xb6   :  { %v389_v29 = vpop.eup %388 }
  0xb7   :  { %212 = vmatmul.f32.vlgmr.msra.gmra.mxu2 %v389_v29 }
  0xbb   :  { %v137_v31 = vpop.f32.mrf.mxu0 }
  0xbc   :  { %v138_v32 = vadd.f32 %v698_v24, %v137_v31 }
  0xc3   :  { %v140_v37 = vpop.f32.mrf.mxu0 }
  0xc4   :  { %v141_v38 = vadd.f32 %v698_v24, %v140_v37 }
  0xcb   :  { %v143_v43 = vpop.f32.mrf.mxu0 }
  0xcc   :  { %v144_v44 = vadd.f32 %v698_v24, %v143_v43 }
  0xd3   :  { %v146_v50 = vpop.f32.mrf.mxu0 }
  0xd4   :  { %v147_v51 = vadd.f32 %v698_v24, %v146_v50 }
  0xdb   :  { %v149_v56 = vpop.f32.mrf.mxu0 }
  0xdc   :  { %v150_v57 = vadd.f32 %v698_v24, %v149_v56 }
  0xe3   :  { %v152_v61 = vpop.f32.mrf.mxu0 }
  0xe4   :  { %v153_v63 = vadd.f32 %v698_v24, %v152_v61 }
  0xeb   :  { %v155_v62 = vpop.f32.mrf.mxu0 }
  0xec   :  { %v156_v3 = vadd.f32 %v698_v24, %v155_v62 }
 0x13a   :  { %v213_v33 = vpop.f32.mrf.mxu2 }
 0x13b   :  { %v216_v34 = vadd.f32 %v213_v33, %v138_v32 }
 0x13d   :  { %390 = vtanh.f32 %v216_v34 }
 0x143   :  { %v391_v35 = vpop.eup %390 }
 0x144   :  { %234 = vmatmul.f32.vlgmr.msra.gmra.mxu3 %v391_v35 }
 0x1c7   :  { %v235_v39 = vpop.f32.mrf.mxu3 }
 0x1c8   :  { %v238_v40 = vadd.f32 %v235_v39, %v141_v38 }
 0x1ca   :  { %392 = vtanh.f32 %v238_v40 }
 0x1d0   :  { %v393_v41 = vpop.eup %392 }
 0x1d1   :  { %256 = vmatmul.f32.vlgmr.msrb.gmra.mxu1 %v393_v41 }
 0x24e   :  { %v257_v45 = vpop.f32.mrf.mxu1 }
 0x24f   :  { %v260_v46 = vadd.f32 %v257_v45, %v144_v44 }
 0x251   :  { %394 = vtanh.f32 %v260_v46 }
 0x257   :  { %v395_v47 = vpop.eup %394 }
 0x258   :  { %278 = vmatmul.f32.vlgmr.msrb.gmra.mxu2 %v395_v47 }
 0x2db   :  { %v279_v52 = vpop.f32.mrf.mxu2 }
 0x2dc   :  { %v282_v53 = vadd.f32 %v279_v52, %v147_v51 }
 0x2de   :  { %396 = vtanh.f32 %v282_v53 }
 0x2e4   :  { %v397_v54 = vpop.eup %396 }
 0x2e5   :  { %300 = vmatmul.f32.vlgmr.msrb.gmra.mxu3 %v397_v54 }
 0x368   :  { %v301_v58 = vpop.f32.mrf.mxu3 }
 0x369   :  { %v304_v59 = vadd.f32 %v301_v58, %v150_v57 }
 0x36b   :  { %398 = vtanh.f32 %v304_v59 }
 0x371   :  { %v399_v60 = vpop.eup %398 }
 0x372   :  { %322 = vmatmul.f32.vlgmr.msrb.gmra.mxu0 %v399_v60 }
 0x3ef   :  { %v323_v0 = vpop.f32.mrf.mxu0 }
 0x3f0   :  { %v326_v1 = vadd.f32 %v323_v0, %v153_v63 }
 0x3f2   :  { %400 = vtanh.f32 %v326_v1 }
 0x3f8   :  { %v401_v2 = vpop.eup %400 }
 0x3f9   :  { %344 = vmatmul.f32.vlgmr.msra.gmra.mxu1 %v401_v2 }
 0x476   :  { %v345_v4 = vpop.f32.mrf.mxu1 }
 0x477   :  { %v348_v5 = vadd.f32 %v345_v4, %v156_v3 }
 0x479   :  { %402 = vtanh.f32 %v348_v5 }
 0x47f   :  { %v403_v7 = vpop.eup %402 }
 0x480   :  { %v354_v8 = vmul.f32 %v403_v7, %v386_v6 }
 0x482   :  { %355 = vadd.xlane.f32.xlu0 %v354_v8 }
 0x4f5   :  { %v356_v10 = vpop.xlane.xlu0 %355 }
 0x4f6   :  { %v361_v11 = vadd.f32 %v387_v9, %v356_v10 }
 0x4f8   :  { %363 = vst.msk [vmem:[%s726_s6] sm:$0xff] %vm362_vm2, %v361_v11 }
 0x4f9   :  { %368 = vsyncpa [#allocation4], 1 }
 0x4fa   :  { %369 = vsyncpa [#allocation6], 1 }

</bundles_post_ra>
